<compile_context>
chip_gen: v6e
topology: v6e:2x2x1
jax: 0.10.0
libtpu: 0.0.40
codegen_flags: <defaults>
</compile_context>

<pallas_src>
import functools

import jax
import jax.numpy as jnp
from jax.experimental import pallas as pl
from jax.experimental.pallas import tpu as pltpu


def _round_up(x, m):
    return ((x + m - 1) // m) * m


def _wce_dice_kernel(x_ref, t_ref, w_ref,
                     probsum_ref, intersum_ref, onehotsum_ref, ce_num_ref):
    # Accumulators are resident across the (batch, pixel-tile) reduction axes;
    # each megacore partition (leading grid axis) owns its own output row, so
    # init at the start of that partition's sequential sweep.
    @pl.when((pl.program_id(1) == 0) & (pl.program_id(2) == 0))
    def _():
        probsum_ref[...] = jnp.zeros_like(probsum_ref)
        intersum_ref[...] = jnp.zeros_like(intersum_ref)
        onehotsum_ref[...] = jnp.zeros_like(onehotsum_ref)
        ce_num_ref[...] = jnp.zeros_like(ce_num_ref)

    x = x_ref[0].astype(jnp.float32)      # (C, TILE) logits, lane-dense pixels
    t = t_ref[0]                          # (1, TILE) int32 targets (-1 = pad)
    w = w_ref[...].astype(jnp.float32)    # (C, 1)    class weights

    # Numerically-stable softmax / log-softmax over the class (sublane) axis.
    m = jnp.max(x, axis=0, keepdims=True)          # (1, TILE)
    ex = jnp.exp(x - m)                            # (C, TILE)
    denom = jnp.sum(ex, axis=0, keepdims=True)     # (1, TILE)
    probas = ex / denom                            # (C, TILE)  (exact, matches ref)
    logsoft = (x - m) - jnp.log(denom)             # (C, TILE)

    valid = (t >= 0).astype(jnp.float32)           # (1, TILE) padding mask
    class_ids = jax.lax.broadcasted_iota(jnp.int32, x.shape, dimension=0)
    onehot = (class_ids == t).astype(jnp.float32)  # (C, TILE); zero where t == -1

    # Dice statistics: per-class sums over pixels (lane reductions -> (C, 1)).
    probsum_ref[...] += jnp.sum(probas * valid, axis=-1, keepdims=True)[None]
    intersum_ref[...] += jnp.sum(probas * onehot, axis=-1, keepdims=True)[None]
    onehotsum_ref[...] += jnp.sum(onehot, axis=-1, keepdims=True)[None]

    # Weighted cross-entropy numerator (denominator derived in the epilogue).
    wt = jnp.sum(onehot * w, axis=0, keepdims=True)            # (1, TILE) = w[t_p]
    picked = jnp.sum(onehot * logsoft, axis=0, keepdims=True)  # (1, TILE) = logp[t_p]
    ce_num_ref[...] += jnp.sum(-wt * picked, axis=-1, keepdims=True)[None]


def weighted_ce_dice_loss(inputs, targets, class_weights, *, tp=4096, num_parts=2):
    """inputs: (N, C, H, W) float logits; targets: (N, 1, H, W) int class ids."""
    N, C, H, W = inputs.shape
    HW = H * W

    # Glue only: flatten spatial dims. No transpose (NCHW is already
    # pixel-contiguous per class) and no dtype cast (upcast happens in-kernel).
    x = inputs.reshape(N, C, HW)
    t = targets.reshape(N, 1, HW).astype(jnp.int32)
    w = jnp.asarray(class_weights, jnp.float32).reshape(C, 1)

    # Pixel tile on the lane axis (multiple of 128); pad the ragged tail with a
    # -1 target sentinel so it is masked in-kernel.
    tile = min(tp, _round_up(HW, 128))
    tile = _round_up(tile, 128)
    padded = _round_up(HW, tile * num_parts)
    if padded != HW:
        x = jnp.pad(x, ((0, 0), (0, 0), (0, padded - HW)))
        t = jnp.pad(t, ((0, 0), (0, 0), (0, padded - HW)), constant_values=-1)
    tiles_per_part = padded // (tile * num_parts)

    grid = (num_parts, N, tiles_per_part)

    def pix_map(c, n, i):
        return (n, 0, c * tiles_per_part + i)

    def acc_map(c, n, i):
        return (c, 0, 0)

    out_shapes = (
        jax.ShapeDtypeStruct((num_parts, C, 1), jnp.float32),  # sum softmax per class
        jax.ShapeDtypeStruct((num_parts, C, 1), jnp.float32),  # sum softmax*onehot
        jax.ShapeDtypeStruct((num_parts, C, 1), jnp.float32),  # sum onehot per class
        jax.ShapeDtypeStruct((num_parts, 1, 1), jnp.float32),  # CE numerator
    )

    probsum_p, intersum_p, onehotsum_p, ce_num_p = pl.pallas_call(
        _wce_dice_kernel,
        out_shape=out_shapes,
        grid_spec=pltpu.PrefetchScalarGridSpec(
            num_scalar_prefetch=0,
            grid=grid,
            in_specs=[
                pl.BlockSpec((1, C, tile), pix_map),   # logits tile (C on sublanes)
                pl.BlockSpec((1, 1, tile), pix_map),   # targets tile
                pl.BlockSpec((C, 1), lambda c, n, i: (0, 0)),  # class weights
            ],
            out_specs=[
                pl.BlockSpec((1, C, 1), acc_map),
                pl.BlockSpec((1, C, 1), acc_map),
                pl.BlockSpec((1, C, 1), acc_map),
                pl.BlockSpec((1, 1, 1), acc_map),
            ],
        ),
        compiler_params=pltpu.CompilerParams(
            dimension_semantics=("parallel", "arbitrary", "arbitrary")),
    )(x, t, w)

    # Epilogue: combine per-core partials and form the scalar loss.
    probsum = jnp.sum(probsum_p[:, :, 0], axis=0)        # (C,)
    intersum = jnp.sum(intersum_p[:, :, 0], axis=0)      # (C,)
    onehotsum = jnp.sum(onehotsum_p[:, :, 0], axis=0)    # (C,)
    ce_num = jnp.sum(ce_num_p)
    ce_den = jnp.dot(onehotsum, jnp.asarray(class_weights, jnp.float32))

    eps = 1e-07
    intersection = 2.0 * intersum + eps
    cardinality = probsum + onehotsum + eps
    dice_loss = 1.0 - jnp.mean(intersection / cardinality)
    cross = ce_num / ce_den
    return dice_loss * 0.6 + cross * 0.4


def _reference_loss(inputs, targets, class_weights):
    """Pure-JAX reference mirroring the PyTorch module."""
    N, C, H, W = inputs.shape
    x = inputs.astype(jnp.float32)
    t = targets.reshape(N, H, W).astype(jnp.int32)
    w = jnp.asarray(class_weights, jnp.float32)
    eps = 1e-07

    onehot = jax.nn.one_hot(t, C, dtype=jnp.float32)            # (N, H, W, C)
    onehot = jnp.transpose(onehot, (0, 3, 1, 2))                # (N, C, H, W)
    probas = jax.nn.softmax(x, axis=1)
    intersection = 2.0 * jnp.sum(probas * onehot, axis=(0, 2, 3)) + eps
    cardinality = (jnp.sum(probas, axis=(0, 2, 3)) +
                   jnp.sum(onehot, axis=(0, 2, 3)) + eps)
    dice_loss = 1.0 - jnp.mean(intersection / cardinality)

    logp = jax.nn.log_softmax(x, axis=1)                        # (N, C, H, W)
    picked = jnp.take_along_axis(logp, t[:, None], axis=1)[:, 0]  # (N, H, W)
    wt = w[t]
    cross = jnp.sum(-wt * picked) / jnp.sum(wt)
    return dice_loss * 0.6 + cross * 0.4


if __name__ == "__main__":
    N, C, H, W = 2, 4, 16, 16
    class_weights = [1.0, 2.0, 0.5, 1.5]  # deterministic, matches C

    key = jax.random.PRNGKey(0)
    k_x, k_t = jax.random.split(key)
    inputs = jax.random.normal(k_x, (N, C, H, W), dtype=jnp.float32)
    targets = jax.random.randint(k_t, (N, 1, H, W), 0, C, dtype=jnp.int32)

    loss_fn = jax.jit(functools.partial(weighted_ce_dice_loss,
                                        class_weights=class_weights))
    loss = jax.block_until_ready(loss_fn(inputs, targets))

    ref = jax.block_until_ready(_reference_loss(inputs, targets, class_weights))
    assert jnp.allclose(loss, ref, rtol=1e-5, atol=1e-5), (loss, ref)

    print("KERNEL_OK")
</pallas_src>

<mosaic_0001>
module attributes {stable_mosaic.version = 11 : i64} {
  func.func @_wce_dice_kernel(%arg0: i32, %arg1: i32, %arg2: i32, %arg3: memref<1x4x256xf32, #tpu.memory_space<vmem>>, %arg4: memref<1x1x256xi32, #tpu.memory_space<vmem>>, %arg5: memref<4x1xf32, #tpu.memory_space<vmem>>, %arg6: memref<1x4x1xf32, #tpu.memory_space<vmem>>, %arg7: memref<1x4x1xf32, #tpu.memory_space<vmem>>, %arg8: memref<1x4x1xf32, #tpu.memory_space<vmem>>, %arg9: memref<1x1x1xf32, #tpu.memory_space<vmem>>) attributes {dimension_semantics = [#tpu.dimension_semantics<parallel>, #tpu.dimension_semantics<arbitrary>, #tpu.dimension_semantics<arbitrary>], iteration_bounds = array<i64: 2, 2, 1>, scalar_prefetch = 0 : i64, scratch_operands = 0 : i64, tpu.core_type = #tpu.core_type<tc>, window_params = [{transform_indices = @transform_0, window_bounds = array<i64: 1, 4, 256>}, {transform_indices = @transform_1, window_bounds = array<i64: 1, 1, 256>}, {pipeline_mode = #tpu.pipeline_mode<synchronous>, transform_indices = @transform_2, window_bounds = array<i64: 4, 1>}, {transform_indices = @transform_3, window_bounds = array<i64: 1, 4, 1>}, {transform_indices = @transform_4, window_bounds = array<i64: 1, 4, 1>}, {transform_indices = @transform_5, window_bounds = array<i64: 1, 4, 1>}, {transform_indices = @transform_6, window_bounds = array<i64: 1, 1, 1>}]} {
    %c0_i32 = arith.constant 0 : i32
    %0 = arith.cmpi eq, %arg1, %c0_i32 : i32
    %c0_i32_0 = arith.constant 0 : i32
    %1 = arith.cmpi eq, %arg2, %c0_i32_0 : i32
    %2 = arith.andi %0, %1 : i1
    %3 = arith.extui %2 : i1 to i32
    %c0_i32_1 = arith.constant 0 : i32
    %4 = arith.cmpi ne, %3, %c0_i32_1 : i32
    scf.if %4 {
      %cst_42 = arith.constant 0.000000e+00 : f32
      %70 = vector.broadcast %cst_42 : f32 to vector<1x4x1xf32>
      %c0_43 = arith.constant 0 : index
      %c0_44 = arith.constant 0 : index
      %c0_45 = arith.constant 0 : index
      %71 = vector.load %arg6[%c0_43, %c0_44, %c0_45] : memref<1x4x1xf32, #tpu.memory_space<vmem>>, vector<1x4x1xf32>
      tpu.vector_store %arg6[%c0_43, %c0_44, %c0_45], %70 {strides = array<i32>} : memref<1x4x1xf32, #tpu.memory_space<vmem>>, vector<1x4x1xf32>,
      %cst_46 = arith.constant 0.000000e+00 : f32
      %72 = vector.broadcast %cst_46 : f32 to vector<1x4x1xf32>
      %c0_47 = arith.constant 0 : index
      %c0_48 = arith.constant 0 : index
      %c0_49 = arith.constant 0 : index
      %73 = vector.load %arg7[%c0_47, %c0_48, %c0_49] : memref<1x4x1xf32, #tpu.memory_space<vmem>>, vector<1x4x1xf32>
      tpu.vector_store %arg7[%c0_47, %c0_48, %c0_49], %72 {strides = array<i32>} : memref<1x4x1xf32, #tpu.memory_space<vmem>>, vector<1x4x1xf32>,
      %cst_50 = arith.constant 0.000000e+00 : f32
      %74 = vector.broadcast %cst_50 : f32 to vector<1x4x1xf32>
      %c0_51 = arith.constant 0 : index
      %c0_52 = arith.constant 0 : index
      %c0_53 = arith.constant 0 : index
      %75 = vector.load %arg8[%c0_51, %c0_52, %c0_53] : memref<1x4x1xf32, #tpu.memory_space<vmem>>, vector<1x4x1xf32>
      tpu.vector_store %arg8[%c0_51, %c0_52, %c0_53], %74 {strides = array<i32>} : memref<1x4x1xf32, #tpu.memory_space<vmem>>, vector<1x4x1xf32>,
      %cst_54 = arith.constant 0.000000e+00 : f32
      %76 = vector.broadcast %cst_54 : f32 to vector<1x1x1xf32>
      %c0_55 = arith.constant 0 : index
      %c0_56 = arith.constant 0 : index
      %c0_57 = arith.constant 0 : index
      %77 = vector.load %arg9[%c0_55, %c0_56, %c0_57] : memref<1x1x1xf32, #tpu.memory_space<vmem>>, vector<1x1x1xf32>
      tpu.vector_store %arg9[%c0_55, %c0_56, %c0_57], %76 {strides = array<i32>} : memref<1x1x1xf32, #tpu.memory_space<vmem>>, vector<1x1x1xf32>,
    } else {
    }
    %c0 = arith.constant 0 : index
    %c0_2 = arith.constant 0 : index
    %c0_3 = arith.constant 0 : index
    %5 = vector.load %arg3[%c0, %c0_2, %c0_3] : memref<1x4x256xf32, #tpu.memory_space<vmem>>, vector<1x4x256xf32>
    %6 = vector.shape_cast %5 : vector<1x4x256xf32> to vector<4x256xf32>
    %c0_4 = arith.constant 0 : index
    %c0_5 = arith.constant 0 : index
    %c0_6 = arith.constant 0 : index
    %7 = vector.load %arg4[%c0_4, %c0_5, %c0_6] : memref<1x1x256xi32, #tpu.memory_space<vmem>>, vector<1x1x256xi32>
    %8 = vector.shape_cast %7 : vector<1x1x256xi32> to vector<1x256xi32>
    %c0_7 = arith.constant 0 : index
    %c0_8 = arith.constant 0 : index
    %9 = vector.load %arg5[%c0_7, %c0_8] : memref<4x1xf32, #tpu.memory_space<vmem>>, vector<4x1xf32>
    %cst = arith.constant dense<0xFF800000> : vector<256xf32>
    %10 = vector.multi_reduction <maximumf>, %6, %cst [0] : vector<4x256xf32> to vector<256xf32>
    %11 = vector.shape_cast %10 : vector<256xf32> to vector<1x256xf32>
    %12 = vector.broadcast %11 : vector<1x256xf32> to vector<4x256xf32>
    %13 = arith.subf %6, %12 : vector<4x256xf32>
    %14 = math.exp %13 : vector<4x256xf32>
    %cst_9 = arith.constant dense<0.000000e+00> : vector<256xf32>
    %15 = vector.multi_reduction <add>, %14, %cst_9 [0] : vector<4x256xf32> to vector<256xf32>
    %16 = vector.shape_cast %15 : vector<256xf32> to vector<1x256xf32>
    %17 = vector.broadcast %16 : vector<1x256xf32> to vector<4x256xf32>
    %18 = arith.divf %14, %17 : vector<4x256xf32>
    %19 = vector.broadcast %11 : vector<1x256xf32> to vector<4x256xf32>
    %20 = arith.subf %6, %19 : vector<4x256xf32>
    %21 = math.log %16 : vector<1x256xf32>
    %22 = vector.broadcast %21 : vector<1x256xf32> to vector<4x256xf32>
    %23 = arith.subf %20, %22 : vector<4x256xf32>
    %c0_i32_10 = arith.constant 0 : i32
    %24 = vector.broadcast %c0_i32_10 : i32 to vector<1x256xi32>
    %25 = arith.cmpi sge, %8, %24 : vector<1x256xi32>
    %26 = arith.extui %25 : vector<1x256xi1> to vector<1x256xi32>
    %27 = arith.sitofp %26 : vector<1x256xi32> to vector<1x256xf32>
    %28 = tpu.iota {dimensions = array<i32: 0>} : vector<4x256xi32>
    %29 = vector.broadcast %8 : vector<1x256xi32> to vector<4x256xi32>
    %30 = arith.cmpi eq, %28, %29 : vector<4x256xi32>
    %31 = arith.extui %30 : vector<4x256xi1> to vector<4x256xi32>
    %32 = arith.sitofp %31 : vector<4x256xi32> to vector<4x256xf32>
    %c0_11 = arith.constant 0 : index
    %c0_12 = arith.constant 0 : index
    %c0_13 = arith.constant 0 : index
    %33 = vector.load %arg6[%c0_11, %c0_12, %c0_13] : memref<1x4x1xf32, #tpu.memory_space<vmem>>, vector<1x4x1xf32>
    %34 = vector.broadcast %27 : vector<1x256xf32> to vector<4x256xf32>
    %35 = arith.mulf %18, %34 : vector<4x256xf32>
    %cst_14 = arith.constant dense<0.000000e+00> : vector<4xf32>
    %36 = vector.multi_reduction <add>, %35, %cst_14 [1] : vector<4x256xf32> to vector<4xf32>
    %37 = vector.shape_cast %36 : vector<4xf32> to vector<4x1xf32>
    %38 = vector.shape_cast %37 : vector<4x1xf32> to vector<1x4x1xf32>
    %39 = arith.addf %33, %38 : vector<1x4x1xf32>
    %c0_15 = arith.constant 0 : index
    %c0_16 = arith.constant 0 : index
    %c0_17 = arith.constant 0 : index
    %40 = vector.load %arg6[%c0_15, %c0_16, %c0_17] : memref<1x4x1xf32, #tpu.memory_space<vmem>>, vector<1x4x1xf32>
    tpu.vector_store %arg6[%c0_15, %c0_16, %c0_17], %39 {strides = array<i32>} : memref<1x4x1xf32, #tpu.memory_space<vmem>>, vector<1x4x1xf32>,
    %c0_18 = arith.constant 0 : index
    %c0_19 = arith.constant 0 : index
    %c0_20 = arith.constant 0 : index
    %41 = vector.load %arg7[%c0_18, %c0_19, %c0_20] : memref<1x4x1xf32, #tpu.memory_space<vmem>>, vector<1x4x1xf32>
    %42 = arith.mulf %18, %32 : vector<4x256xf32>
    %cst_21 = arith.constant dense<0.000000e+00> : vector<4xf32>
    %43 = vector.multi_reduction <add>, %42, %cst_21 [1] : vector<4x256xf32> to vector<4xf32>
    %44 = vector.shape_cast %43 : vector<4xf32> to vector<4x1xf32>
    %45 = vector.shape_cast %44 : vector<4x1xf32> to vector<1x4x1xf32>
    %46 = arith.addf %41, %45 : vector<1x4x1xf32>
    %c0_22 = arith.constant 0 : index
    %c0_23 = arith.constant 0 : index
    %c0_24 = arith.constant 0 : index
    %47 = vector.load %arg7[%c0_22, %c0_23, %c0_24] : memref<1x4x1xf32, #tpu.memory_space<vmem>>, vector<1x4x1xf32>
    tpu.vector_store %arg7[%c0_22, %c0_23, %c0_24], %46 {strides = array<i32>} : memref<1x4x1xf32, #tpu.memory_space<vmem>>, vector<1x4x1xf32>,
    %c0_25 = arith.constant 0 : index
    %c0_26 = arith.constant 0 : index
    %c0_27 = arith.constant 0 : index
    %48 = vector.load %arg8[%c0_25, %c0_26, %c0_27] : memref<1x4x1xf32, #tpu.memory_space<vmem>>, vector<1x4x1xf32>
    %cst_28 = arith.constant dense<0.000000e+00> : vector<4xf32>
    %49 = vector.multi_reduction <add>, %32, %cst_28 [1] : vector<4x256xf32> to vector<4xf32>
    %50 = vector.shape_cast %49 : vector<4xf32> to vector<4x1xf32>
    %51 = vector.shape_cast %50 : vector<4x1xf32> to vector<1x4x1xf32>
    %52 = arith.addf %48, %51 : vector<1x4x1xf32>
    %c0_29 = arith.constant 0 : index
    %c0_30 = arith.constant 0 : index
    %c0_31 = arith.constant 0 : index
    %53 = vector.load %arg8[%c0_29, %c0_30, %c0_31] : memref<1x4x1xf32, #tpu.memory_space<vmem>>, vector<1x4x1xf32>
    tpu.vector_store %arg8[%c0_29, %c0_30, %c0_31], %52 {strides = array<i32>} : memref<1x4x1xf32, #tpu.memory_space<vmem>>, vector<1x4x1xf32>,
    %54 = vector.broadcast %9 : vector<4x1xf32> to vector<4x256xf32>
    %55 = arith.mulf %32, %54 : vector<4x256xf32>
    %cst_32 = arith.constant dense<0.000000e+00> : vector<256xf32>
    %56 = vector.multi_reduction <add>, %55, %cst_32 [0] : vector<4x256xf32> to vector<256xf32>
    %57 = vector.shape_cast %56 : vector<256xf32> to vector<1x256xf32>
    %58 = arith.mulf %32, %23 : vector<4x256xf32>
    %cst_33 = arith.constant dense<0.000000e+00> : vector<256xf32>
    %59 = vector.multi_reduction <add>, %58, %cst_33 [0] : vector<4x256xf32> to vector<256xf32>
    %60 = vector.shape_cast %59 : vector<256xf32> to vector<1x256xf32>
    %c0_34 = arith.constant 0 : index
    %c0_35 = arith.constant 0 : index
    %c0_36 = arith.constant 0 : index
    %61 = vector.load %arg9[%c0_34, %c0_35, %c0_36] : memref<1x1x1xf32, #tpu.memory_space<vmem>>, vector<1x1x1xf32>
    %cst_37 = arith.constant 0.000000e+00 : f32
    %62 = vector.broadcast %cst_37 : f32 to vector<1x256xf32>
    %63 = arith.subf %62, %57 : vector<1x256xf32>
    %64 = arith.mulf %63, %60 : vector<1x256xf32>
    %cst_38 = arith.constant dense<0.000000e+00> : vector<1xf32>
    %65 = vector.multi_reduction <add>, %64, %cst_38 [1] : vector<1x256xf32> to vector<1xf32>
    %66 = vector.shape_cast %65 : vector<1xf32> to vector<1x1xf32>
    %67 = vector.shape_cast %66 : vector<1x1xf32> to vector<1x1x1xf32>
    %68 = arith.addf %61, %67 : vector<1x1x1xf32>
    %c0_39 = arith.constant 0 : index
    %c0_40 = arith.constant 0 : index
    %c0_41 = arith.constant 0 : index
    %69 = vector.load %arg9[%c0_39, %c0_40, %c0_41] : memref<1x1x1xf32, #tpu.memory_space<vmem>>, vector<1x1x1xf32>
    tpu.vector_store %arg9[%c0_39, %c0_40, %c0_41], %68 {strides = array<i32>} : memref<1x1x1xf32, #tpu.memory_space<vmem>>, vector<1x1x1xf32>,
    return
  }
  func.func @transform_0(%arg0: i32, %arg1: i32, %arg2: i32) -> (i32, i32, i32) {
    %c1_i32 = arith.constant 1 : i32
    %0 = arith.muli %arg0, %c1_i32 : i32
    %1 = arith.addi %0, %arg2 : i32
    %c0_i32 = arith.constant 0 : i32
    %c0_i32_0 = arith.constant 0 : i32
    return %arg1, %c0_i32, %1 : i32, i32, i32
  }
  func.func @transform_1(%arg0: i32, %arg1: i32, %arg2: i32) -> (i32, i32, i32) {
    %c1_i32 = arith.constant 1 : i32
    %0 = arith.muli %arg0, %c1_i32 : i32
    %1 = arith.addi %0, %arg2 : i32
    %c0_i32 = arith.constant 0 : i32
    %c0_i32_0 = arith.constant 0 : i32
    return %arg1, %c0_i32, %1 : i32, i32, i32
  }
  func.func @transform_2(%arg0: i32, %arg1: i32, %arg2: i32) -> (i32, i32) {
    %c0_i32 = arith.constant 0 : i32
    %c0_i32_0 = arith.constant 0 : i32
    %c0_i32_1 = arith.constant 0 : i32
    return %c0_i32, %c0_i32_0 : i32, i32
  }
  func.func @transform_3(%arg0: i32, %arg1: i32, %arg2: i32) -> (i32, i32, i32) {
    %c0_i32 = arith.constant 0 : i32
    %c0_i32_0 = arith.constant 0 : i32
    %c0_i32_1 = arith.constant 0 : i32
    return %arg0, %c0_i32, %c0_i32_0 : i32, i32, i32
  }
  func.func @transform_4(%arg0: i32, %arg1: i32, %arg2: i32) -> (i32, i32, i32) {
    %c0_i32 = arith.constant 0 : i32
    %c0_i32_0 = arith.constant 0 : i32
    %c0_i32_1 = arith.constant 0 : i32
    return %arg0, %c0_i32, %c0_i32_0 : i32, i32, i32
  }
  func.func @transform_5(%arg0: i32, %arg1: i32, %arg2: i32) -> (i32, i32, i32) {
    %c0_i32 = arith.constant 0 : i32
    %c0_i32_0 = arith.constant 0 : i32
    %c0_i32_1 = arith.constant 0 : i32
    return %arg0, %c0_i32, %c0_i32_0 : i32, i32, i32
  }
  func.func @transform_6(%arg0: i32, %arg1: i32, %arg2: i32) -> (i32, i32, i32) {
    %c0_i32 = arith.constant 0 : i32
    %c0_i32_0 = arith.constant 0 : i32
    %c0_i32_1 = arith.constant 0 : i32
    return %arg0, %c0_i32, %c0_i32_0 : i32, i32, i32
  }
}

</mosaic_0001>

<bundles_post_ra>
// kernel: weighted_ce_dice_loss.1
= control target key start
LH: loop header
LB: loop body
LE: loop exit
PB: predicated region body
PF: predicated region fallthrough
CT: control target
= control target key end

     0   :  { %s877_s21 = smov 0   ;;  %s879_s22 = smov 0   ;;  %s998_s0 = inlined_call_operand.vmem [shape: f32[2,4,512], index: 0, kind: input, shape index: {}]   ;;  %s999_s1 = inlined_call_operand.vmem [shape: s32[2,1,512], index: 1, kind: input, shape index: {}]   ;;  %s1000_s2 = inlined_call_operand.vmem [shape: f32[4,1], index: 2, kind: input, shape index: {}]   ;;  %s1001_s3 = inlined_call_operand.vmem [shape: f32[2,4,1], index: 3, kind: output, shape index: {0}]   ;;  %s1002_s4 = inlined_call_operand.vmem [shape: f32[2,4,1], index: 4, kind: output, shape index: {1}]   ;;  %s1003_s5 = inlined_call_operand.vmem [shape: f32[2,4,1], index: 5, kind: output, shape index: {2}]   ;;  %s1004_s6 = inlined_call_operand.vmem [shape: f32[2,1,1], index: 6, kind: output, shape index: {3}]  }
   0x1   :  { %s881_s23 = smov 0   ;;  %s883_s24 = smov 0  }
   0x2   :  { %s885_s25 = smov 0  }
   0x3 LB: > { %s32_s26 = sadd.s32 1, %s829_s23  ;;  %s36_s27 = sadd.s32 1, %s833_s24  ;;  %s837_s25 = sphi %s885_s25, %s17_s25   ;;  %s833_s24 = sphi %s883_s24, %s1008_s24   ;;  %s829_s23 = sphi %s881_s23, %s1007_s23   ;;  %s825_s22 = sphi %s879_s22, %s1006_s22   ;;  %s821_s21 = sphi %s877_s21, %s1005_s21  }
   0x4   : > { %p34_p0 = scmp.ge.s32.totalorder %s32_s26, 2  ;;  %p730_p1 = scmp.ge.s32.totalorder %s837_s25, 1 }
   0x5   : > { %p269_p2 = scmp.lt.s32.totalorder %s837_s25, 5 }
   0x6   : > { %s1010_s26 = smov (%p34_p0, %s32_s26), 0  ;;  %s1012_s27 = smov (!%p34_p0, %s36_s27), %s833_s24 }
   0x7   : > { %p270_p3 = pnand %p730_p1, %p269_p2  ;;  %p38_p4 = scmp.ge.s32.totalorder %s1012_s27, 2 }
   0x8   : > { %s731_s28 = sshll.u32 (!%p270_p3), %s825_s22, 1  ;;  %p325_p5 = scmp.lt.s32.totalorder (!%p270_p3), %s821_s21, 1 }
   0x9   : > { %s1014_s27 = smov (%p38_p4, %s1012_s27), 0  ;;  %273 = sbr.rel (%p270_p3) target bundleno = 314 (0x13a), region = 32 }
   0xa   : > { %p327_p6 = scmp.lt.s32.totalorder (!%p270_p3), %s731_s28, 3  ;;  %p346_p7 = scmp.lt.s32.totalorder (!%p270_p3), %s825_s22, 1 }
   0xb   : > { %p361_p8 = scmp.eq.s32.totalorder (!%p270_p3), %s821_s21, 0 }
   0xe   : > { %s326_s29 = scalar_select %p325_p5, %s821_s21, 1  ;;  %vm367_vm0 = vcmask (%p361_p8), 3072   ;;  %vm371_vm1 = vcmask (%p361_p8), 0   ;;  %v839_v0 = vmov (%p361_p8), 0.0  }
   0xf   : > { %s1016_s28 = smov (!%p327_p6, %s731_s28), 3  ;;  %s1018_s22 = smov (!%p346_p7, %s825_s22), 1 }
  0x10   : > { %s732_s30 = sshll.u32 %s326_s29, 2  ;;  %s736_s15 = sshll.u32 %s1018_s22, 2 }
  0x11   : > { %s912_s7 = sadd.s32 %s732_s30, %s1016_s28  ;;  %s925_s18 = scalar_lea.vmem %s1004_s6, %s1018_s22 }
  0x12   : > { %s733_s8 = sshll.u32 %s912_s7, 2  ;;  %s343_s11 = scalar_lea.vmem %s999_s1, %s912_s7  ;;  %372 = vst.msk [vmem:[%s925_s18] sm:$0x1] (%p361_p8), %vm371_vm1, %v839_v0 }
  0x13   : > { %s332_s14 = scalar_lea.vmem %s998_s0, %s733_s8  ;;  %s930_s21 = scalar_lea.vmem %s1001_s3, %s736_s15 }
  0x14   : > { %s935_s30 = scalar_lea.vmem %s1002_s4, %s736_s15  ;;  %s940_s8 = scalar_lea.vmem %s1003_s5, %s736_s15  ;;  %368 = vst.msk [vmem:[%s930_s21] sm:$0xf] (%p361_p8), %vm367_vm0, %v839_v0 }
  0x15   : > { %366 = sbr.rel (!%p361_p8) target bundleno = 26 (0x1a), region = 36  ;;  %369 = vst.msk [vmem:[%s935_s30] sm:$0xf] (%p361_p8), %vm367_vm0, %v839_v0  ;;  %370 = vst.msk [vmem:[%s940_s8] sm:$0xf] (%p361_p8), %vm367_vm0, %v839_v0 }
  0x1a PF: > { %v375_v1 = vld [vmem:[%s1000_s2] sm:$0xf]  ;;  %vm379_vm2 = vcmask 1043456   ;;  %v436_v2 = vlaneseq  ;;  %v840_v4 = vmov 0   ;;  %v841_v21 = vmov 0.0  }
  0x1b   : > { %v373_v3 = vld [vmem:[%s332_s14] sm:$0xff]  ;;  %789 = vset.pattern.permute.xlu0 %v840_v4  ;;  %vm474_vm6 = vcmask 3072   ;;  %vm549_vm7 = vcmask 0  }
  0x1c   : > { %v377_v5 = vcombine.high %v373_v3, %v373_v3  ;;  %v380_v6 = vsel %vm379_vm2, %v373_v3, -inf  ;;  %502 = vperm.xlu0 %789, %v375_v1   ;;  %v437_v7 = vshrl.u32 %v436_v2, 7  ;;  %v374_v9 = vld [vmem:[%s343_s11] sm:$0x3] }
  0x1d   : > { %v381_v8 = vrot.slane %v380_v6, 4  ;;  %vm433_vm5 = vcmp.ge.s32.totalorder %v374_v9, 0 }
  0x1e   : > { %v387_v10 = vsel %vm379_vm2, %v377_v5, -inf  ;;  %v440_v11 = vsub.s32 0, %v437_v7  ;;  %v444_v12 = vsub.s32 1, %v437_v7  ;;  %v740_v52 = vsel %vm433_vm5, 1.0, %v841_v21 }
  0x1f   : > { %v382_v13 = vmax.f32 %v380_v6, %v381_v8  ;;  %v388_v14 = vrot.slane %v387_v10, 4 }
  0x20   : > { %v441_v17 = vrot.slane %v374_v9, %v440_v11  ;;  %v445_v18 = vrot.slane %v374_v9, %v444_v12  ;;  %v457_v53 = vrot.slane %v740_v52, %v440_v11  ;;  %v461_v54 = vrot.slane %v740_v52, %v444_v12 }
  0x21   : > { %v383_v15 = vrot.slane %v382_v13, 2  ;;  %v389_v16 = vmax.f32 %v387_v10, %v388_v14 }
  0x22   : > { %vm446_vm3 = vcmp.eq.s32.totalorder %v437_v7, %v441_v17  ;;  %vm447_vm4 = vcmp.eq.s32.totalorder %v437_v7, %v445_v18  ;;  %v462_v56 = vcombine.low %v457_v53, %v461_v54  ;;  %v476_v53 = vld [vmem:[%s935_s30] sm:$0xf] }
  0x23   : > { %v384_v19 = vmax.f32 %v382_v13, %v383_v15  ;;  %v390_v20 = vrot.slane %v389_v16, 2  ;;  %v951_v22 = vsel %vm446_vm3, 1.0, %v841_v21  ;;  %v953_v23 = vsel %vm447_vm4, 1.0, %v841_v21  ;;  %v452_v54 = vld [vmem:[%s930_s21] sm:$0xf] }
  0x24   : > { %v493_v26 = vsel %vm379_vm2, %v951_v22, 0.0  ;;  %v494_v27 = vsel %vm379_vm2, %v953_v23, 0.0  ;;  %v479_v55 = vcombine.low %v951_v22, %v953_v23 }
  0x25   : > { %v385_v24 = vrot.slane %v384_v19, 1  ;;  %v391_v25 = vmax.f32 %v389_v16, %v390_v20  ;;  %v495_v28 = vadd.f32 %v494_v27, %v493_v26 }
  0x27   : > { %v386_v29 = vmax.f32 %v384_v19, %v385_v24  ;;  %v392_v30 = vrot.slane %v391_v25, 1  ;;  %496 = vadd.xlane.f32.xlu1 %v495_v28 }
  0x29   : > { %v393_v31 = vmax.f32 %v391_v25, %v392_v30 }
  0x2b   : > { %v396_v32 = vcombine.low %v386_v29, %v393_v31 }
  0x2d   : > { %v398_v33 = vsub.f32 %v373_v3, %v396_v32 }
  0x2f   : > { %v399_v34 = vmul.f32 1.442695, %v398_v33 }
  0x31   : > { %791 = vpow2.f32 %v399_v34 }
  0x3e   : > { %v792_v35 = vpop.eup %791 }
  0x3f   : > { %v402_v36 = vcombine.high %v792_v35, %v792_v35  ;;  %v404_v37 = vsel %vm379_vm2, %v792_v35, 0.0 }
  0x40   : > { %v405_v38 = vrot.slane %v404_v37, 4 }
  0x41   : > { %v411_v39 = vsel %vm379_vm2, %v402_v36, 0.0 }
  0x42   : > { %v406_v40 = vadd.f32 %v405_v38, %v404_v37  ;;  %v412_v41 = vrot.slane %v411_v39, 4 }
  0x44   : > { %v407_v42 = vrot.slane %v406_v40, 2  ;;  %v413_v43 = vadd.f32 %v412_v41, %v411_v39 }
  0x46   : > { %v408_v44 = vadd.f32 %v407_v42, %v406_v40  ;;  %v414_v45 = vrot.slane %v413_v43, 2 }
  0x48   : > { %v409_v46 = vrot.slane %v408_v44, 1  ;;  %v415_v47 = vadd.f32 %v414_v45, %v413_v43 }
  0x4a   : > { %v416_v48 = vrot.slane %v415_v47, 1  ;;  %v410_v49 = vadd.f32 %v409_v46, %v408_v44 }
  0x4c   : > { %v417_v50 = vadd.f32 %v416_v48, %v415_v47 }
  0x4e   : > { %v420_v51 = vcombine.low %v410_v49, %v417_v50 }
  0x50   : > { %793 = vrcp.f32 %v420_v51 }
  0x51   : > { %795 = vlog2.f32 %v410_v49 }
  0x52   : > { %797 = vlog2.f32 %v417_v50  ;;  %v492_v50 = vld [vmem:[%s940_s8] sm:$0xf] }
  0x5d   : > { %v794_v57 = vpop.eup %793 }
  0x5e   : > { %v423_v58 = vmul.f32 %v794_v57, %v792_v35  ;;  %v796_v5 = vpop.eup %795 }
  0x5f   : > { %v798_v6 = vpop.eup %797  ;;  %v425_v7 = vmul.f32 0.6931472, %v796_v5 }
  0x60   : > { %v481_v59 = vmul.f32 %v479_v55, %v423_v58  ;;  %v464_v60 = vmul.f32 %v462_v56, %v423_v58  ;;  %v427_v8 = vmul.f32 0.6931472, %v798_v6 }
  0x62   : > { %v483_v61 = vcombine.high %v481_v59, %v481_v59  ;;  %v485_v62 = vsel %vm379_vm2, %v481_v59, 0.0  ;;  %v466_v63 = vcombine.high %v464_v60, %v464_v60  ;;  %v468_v0 = vsel %vm379_vm2, %v464_v60, 0.0  ;;  %v540_v59 = vld [vmem:[%s925_s18] sm:$0x1] }
  0x63   : > { %v430_v9 = vcombine.low %v425_v7, %v427_v8 }
  0x64   : > { %v486_v1 = vsel %vm379_vm2, %v483_v61, 0.0  ;;  %v469_v3 = vsel %vm379_vm2, %v466_v63, 0.0 }
  0x65   : > { %v487_v2 = vadd.f32 %v486_v1, %v485_v62  ;;  %v470_v4 = vadd.f32 %v469_v3, %v468_v0  ;;  %v432_v10 = vsub.f32 %v398_v33, %v430_v9 }
  0x67   : > { %488 = vadd.xlane.f32.xlu1 %v487_v2  ;;  %471 = vadd.xlane.f32.xlu0 %v470_v4  ;;  %v522_v11 = vcombine.high %v432_v10, %v432_v10  ;;  %v524_v12 = vmul.f32 %v951_v22, %v432_v10 }
  0x69   : > { %v525_v13 = vmul.f32 %v953_v23, %v522_v11  ;;  %v526_v14 = vsel %vm379_vm2, %v524_v12, 0.0 }
  0x6a   : > { %v527_v16 = vrot.slane %v526_v14, 4 }
  0x6b   : > { %v533_v15 = vsel %vm379_vm2, %v525_v13, 0.0 }
  0x6c   : > { %v534_v17 = vrot.slane %v533_v15, 4  ;;  %v528_v18 = vadd.f32 %v527_v16, %v526_v14 }
  0x6e   : > { %v535_v19 = vadd.f32 %v534_v17, %v533_v15  ;;  %v529_v25 = vrot.slane %v528_v18, 2 }
  0x70   : > { %v536_v26 = vrot.slane %v535_v19, 2  ;;  %v530_v33 = vadd.f32 %v529_v25, %v528_v18 }
  0x72   : > { %v537_v34 = vadd.f32 %v536_v26, %v535_v19 }
  0x74   : > { %v538_v39 = vrot.slane %v537_v34, 1 }
  0x76   : > { %v539_v44 = vadd.f32 %v538_v39, %v537_v34 }
  0x97   : > { %v503_v20 = vpop.permute.xlu0 %502 }
  0x98   : > { %v505_v21 = vmul.f32 %v951_v22, %v503_v20  ;;  %v506_v24 = vmul.f32 %v953_v23, %v503_v20  ;;  %v531_v22 = vrot.slane %v530_v33, 1 }
  0x9a   : > { %v507_v27 = vsel %vm379_vm2, %v505_v21, 0.0  ;;  %v514_v28 = vsel %vm379_vm2, %v506_v24, 0.0  ;;  %v532_v43 = vadd.f32 %v531_v22, %v530_v33 }
  0x9b   : > { %v508_v29 = vrot.slane %v507_v27, 4  ;;  %v515_v30 = vrot.slane %v514_v28, 4 }
  0x9d   : > { %v509_v31 = vadd.f32 %v508_v29, %v507_v27  ;;  %v516_v32 = vadd.f32 %v515_v30, %v514_v28 }
  0x9f   : > { %v510_v35 = vrot.slane %v509_v31, 2  ;;  %v517_v36 = vrot.slane %v516_v32, 2 }
  0xa1   : > { %v511_v37 = vadd.f32 %v510_v35, %v509_v31  ;;  %v518_v38 = vadd.f32 %v517_v36, %v516_v32 }
  0xa3   : > { %v512_v23 = vrot.slane %v511_v37, 1  ;;  %v519_v40 = vrot.slane %v518_v38, 1 }
  0xa5   : > { %v513_v41 = vadd.f32 %v512_v23, %v511_v37  ;;  %v520_v42 = vadd.f32 %v519_v40, %v518_v38 }
  0xa7   : > { %v541_v45 = vsub.f32 0.0, %v513_v41  ;;  %v542_v46 = vsub.f32 0.0, %v520_v42 }
  0xa9   : > { %v543_v47 = vmul.f32 %v541_v45, %v532_v43  ;;  %v544_v48 = vmul.f32 %v542_v46, %v539_v44 }
  0xab   : > { %v545_v49 = vadd.f32 %v544_v48, %v543_v47 }
  0xad   : > { %546 = vadd.xlane.f32.xlu1 %v545_v49 }
  0xb0   : > { %v497_v51 = vpop.xlane.xlu1 %496 }
  0xb1   : > { %v498_v52 = vadd.f32 %v497_v51, %v492_v50 }
  0xb3   : > { %499 = vst.msk [vmem:[%s940_s8] sm:$0xf] %vm474_vm6, %v498_v52 }
  0xf0   : > { %v489_v55 = vpop.xlane.xlu1 %488  ;;  %v472_v57 = vpop.xlane.xlu0 %471 }
  0xf1   : > { %v490_v56 = vadd.f32 %v489_v55, %v476_v53  ;;  %v473_v58 = vadd.f32 %v472_v57, %v452_v54 }
  0xf3   : > { %491 = vst.msk [vmem:[%s935_s30] sm:$0xf] %vm474_vm6, %v490_v56  ;;  %475 = vst.msk [vmem:[%s930_s21] sm:$0xf] %vm474_vm6, %v473_v58 }
 0x136   : > { %v547_v60 = vpop.xlane.xlu1 %546 }
 0x137   : > { %v548_v61 = vadd.f32 %v547_v60, %v540_v59 }
 0x139   : > { %550 = vst.msk [vmem:[%s925_s18] sm:$0x1] %vm549_vm7, %v548_v61 }
 0x13a PF: > { %s17_s25 = sadd.s32 1, %s837_s25   ;;  %s1005_s21 = smov %s829_s23 }
 0x13b   : > { %p14_p9 = scmp.ge.s32.totalorder %s17_s25, 6   ;;  %s1006_s22 = smov %s833_s24 }
 0x13c   : > { %s1007_s23 = smov %s1010_s26  ;;  %s1008_s24 = smov %s1014_s27 }
 0x13d   :  { %16 = sbr.rel (!%p14_p9) target bundleno = 3 (0x3), region = 105 }

</bundles_post_ra>
